<compile_context>
chip_gen: v7x
topology: tpu7x:2x2x1
jax: 0.10.0
libtpu: 0.0.40
codegen_flags: <defaults>
</compile_context>

<pallas_src>
import jax
import jax.numpy as jnp
from jax.experimental import pallas as pl
from jax.experimental.pallas import tpu as pltpu


def _attention_kernel(e1_ref, e2_ref, w_ref, u_ref, out_ref, wqz_ref):
    # e1_ref / e2_ref : (tm, F)  tiles of the two input embeddings (native dtype)
    # w_ref           : (F, O)   w_omega, grid-invariant
    # u_ref           : (1, O)   u_omega reshaped to a lane-dense row
    # out_ref         : (tm, F)  combined embedding
    # wqz_ref         : (tm, 2)  attention weights
    e1 = e1_ref[...]
    e2 = e2_ref[...]
    w = w_ref[...]
    u = u_ref[...]                                   # (1, O) broadcast row

    # v = tanh(emb @ w_omega) — MXU matmul, native-dtype operands, f32 accumulate.
    v1 = jnp.tanh(jnp.dot(e1, w, preferred_element_type=jnp.float32))   # (tm, O)
    v2 = jnp.tanh(jnp.dot(e2, w, preferred_element_type=jnp.float32))   # (tm, O)

    # vu = v @ u_omega — broadcast multiply + lane reduction (exact, f32).
    s1 = jnp.sum(v1 * u, axis=-1, keepdims=True) + 1e-6                 # (tm, 1)
    s2 = jnp.sum(v2 * u, axis=-1, keepdims=True) + 1e-6                 # (tm, 1)

    # Softmax over the pair (dim=1 in the torch code), max-stabilized.
    m = jnp.maximum(s1, s2)
    ex1 = jnp.exp(s1 - m)
    ex2 = jnp.exp(s2 - m)
    inv = 1.0 / (ex1 + ex2)          # exact reciprocal (approx was noise here)
    a1 = ex1 * inv                                   # (tm, 1)
    a2 = ex2 * inv                                   # (tm, 1)

    # emb_combined = emb^T @ wqz  ==  a1 * emb1 + a2 * emb2
    out_ref[...] = (a1 * e1 + a2 * e2).astype(out_ref.dtype)

    # Attention weights: tiny (8 bytes/row) side output, plain masked store.
    wqz_ref[...] = jnp.concatenate([a1, a2], axis=-1).astype(wqz_ref.dtype)


def _round_up(x, m):
    return ((x + m - 1) // m) * m


def _vmem_limit_bytes():
    """Usable scoped-VMEM budget for this kernel (per TensorCore)."""
    try:
        cap = int(pltpu.get_tpu_info().vmem_capacity_bytes)
    except Exception:
        cap = 64 * 1024 * 1024      # conservative: v7x per-TC VMEM
    return cap * 3 // 4             # ~48 MiB on v7x, ~96 MiB on v5e/v6e


def _num_tensorcores():
    """Best-effort TensorCore count per chip (v7x: 2; v5e/v6e: 1)."""
    # TODO(synk): if xprof shows the row axis is not sharded across v7x cores
    # with dimension_semantics=("parallel",), switch to an explicit core axis
    # via pltpu.create_tensorcore_mesh + pl.core_map.
    try:
        info = pltpu.get_tpu_info()
        for attr in ("num_cores", "tensorcores_per_chip", "num_tensorcores",
                     "cores_per_chip", "core_count"):
            v = getattr(info, attr, None)
            if v:
                return max(1, int(v))
    except Exception:
        pass
    return 1


def _choose_tm(n_pad, f, o, in_isz, w_bytes, vmem_budget, num_cores, weight_bufs):
    """Row tile sized by bytes (target ~4 MiB of input per grid step),
    clamped to the VMEM budget, core-count aware."""
    # VMEM-resident bytes per row across pipeline buffers and f32 temporaries.
    per_row = (4 * f * in_isz          # e1, e2 double-buffered inputs
               + 2 * f * in_isz        # combined output double-buffered
               + 2 * 2 * 4             # wqz output double-buffered
               + 2 * o * 4             # v1, v2 temporaries
               + f * 4                 # f32 combine temporary
               + 8 * 4)                # per-row scalars (s, m, ex, a, inv)
    fixed = weight_bufs * w_bytes + (1 << 20)         # weights + slack
    tm_cap = (vmem_budget - fixed) // max(per_row, 1)
    if tm_cap < 8:
        tm_cap = 8   # TODO(synk): feature-axis grid split for huge F*O weights
    # Byte-based DMA target: ~4 MiB per (tm, F) input tile keeps each grid
    # step's DMA well above the ~0.35 us per-step overhead on all generations.
    tm_target = max(256, (4 << 20) // max(f * in_isz, 1))
    tm = min(int(tm_cap), int(tm_target), int(n_pad))
    if num_cores > 1 and n_pad > 8 * num_cores:
        # Give every TensorCore at least one tile of work (byte target already
        # yields many steps per core for large problems).
        tm = min(tm, _round_up((n_pad + num_cores - 1) // num_cores, 8))
    if tm < n_pad:
        step = 256 if tm >= 256 else 8
        tm = max(8, (tm // step) * step)
    return int(tm)


@jax.jit
def attention_layer(emb1, emb2, w_omega, u_omega):
    """Pallas implementation of AttentionLayer.forward.

    emb1, emb2 : (N, in_features)
    w_omega    : (in_features, out_features)
    u_omega    : (out_features, 1)
    returns (emb_combined (N, in_features), wqz (N, 2))
    """
    N, F = emb1.shape
    O = w_omega.shape[1]
    in_isz = jnp.dtype(emb1.dtype).itemsize
    w_isz = jnp.dtype(w_omega.dtype).itemsize
    w_bytes = F * O * w_isz + O * w_isz

    vmem_limit = _vmem_limit_bytes()
    num_cores = _num_tensorcores()

    # Pad rows only to the 8-sublane granule (<= 7 rows), never to tm.
    n_pad = _round_up(N, 8)
    if n_pad != N:
        pad = ((0, n_pad - N), (0, 0))
        emb1 = jnp.pad(emb1, pad)
        emb2 = jnp.pad(emb2, pad)

    # Single-buffer the grid-invariant weights only when they are big enough
    # for the saved VMEM to matter.
    single_buffer_weights = w_bytes >= (4 << 20)
    weight_bufs = 1 if single_buffer_weights else 2

    tm = _choose_tm(n_pad, F, O, in_isz, w_bytes,
                    int(vmem_limit * 0.85), num_cores, weight_bufs)
    grid = pl.cdiv(n_pad, tm)   # partial last block: garbage rows are per-row
                                # independent and their writes are discarded.

    u_row = u_omega.reshape(1, O)   # lane-dense row for the kernel

    w_kw = dict(pipeline_mode=pl.Buffered(1)) if single_buffer_weights else {}
    in_specs = [
        pl.BlockSpec((tm, F), lambda i: (i, 0)),
        pl.BlockSpec((tm, F), lambda i: (i, 0)),
        pl.BlockSpec((F, O), lambda i: (0, 0), **w_kw),
        pl.BlockSpec((1, O), lambda i: (0, 0), **w_kw),
    ]
    out_specs = [
        pl.BlockSpec((tm, F), lambda i: (i, 0)),
        pl.BlockSpec((tm, 2), lambda i: (i, 0)),
    ]

    out, wqz = pl.pallas_call(
        _attention_kernel,
        out_shape=(
            jax.ShapeDtypeStruct((n_pad, F), emb1.dtype),
            jax.ShapeDtypeStruct((n_pad, 2), jnp.float32),
        ),
        grid_spec=pltpu.PrefetchScalarGridSpec(
            num_scalar_prefetch=0,
            grid=(grid,),
            in_specs=in_specs,
            out_specs=out_specs,
        ),
        compiler_params=pltpu.CompilerParams(
            dimension_semantics=("parallel",),
            vmem_limit_bytes=int(vmem_limit),
        ),
    )(emb1, emb2, w_omega, u_row)

    if n_pad != N:                 # avoid slice copies when N is aligned
        out = out[:N]
        wqz = wqz[:N]
    return out, wqz


def _xavier_uniform(key, shape, dtype=jnp.float32):
    fan_in, fan_out = shape
    bound = (6.0 / (fan_in + fan_out)) ** 0.5
    return jax.random.uniform(key, shape, dtype, minval=-bound, maxval=bound)


def _reference(emb1, emb2, w_omega, u_omega):
    """Pure-JAX mirror of the PyTorch forward, for correctness check."""
    hi = jax.lax.Precision.HIGHEST
    emb = jnp.stack([emb1, emb2], axis=1)                           # (N, 2, F)
    v = jnp.tanh(jnp.matmul(emb, w_omega, precision=hi))            # (N, 2, O)
    vu = jnp.matmul(v, u_omega, precision=hi)                       # (N, 2, 1)
    wqz = jax.nn.softmax(jnp.squeeze(vu, -1) + 1e-6, axis=1)        # (N, 2)
    combined = jnp.matmul(jnp.swapaxes(emb, 1, 2), wqz[..., None], precision=hi)
    return jnp.squeeze(combined, -1), wqz


if __name__ == "__main__":
    # Small shapes; N deliberately not a multiple of 8 to exercise padding.
    N, in_features, out_features = 10, 32, 16

    key = jax.random.PRNGKey(0)
    k1, k2, kw, ku = jax.random.split(key, 4)

    emb1 = jax.random.normal(k1, (N, in_features), jnp.float32)
    emb2 = jax.random.normal(k2, (N, in_features), jnp.float32)
    w_omega = _xavier_uniform(kw, (in_features, out_features))
    u_omega = _xavier_uniform(ku, (out_features, 1))

    out, wqz = attention_layer(emb1, emb2, w_omega, u_omega)
    out = jax.block_until_ready(out)
    wqz = jax.block_until_ready(wqz)

    ref_out, ref_wqz = _reference(emb1, emb2, w_omega, u_omega)
    assert out.shape == (N, in_features) and wqz.shape == (N, 2)
    assert jnp.allclose(out, ref_out, atol=5e-3, rtol=5e-3)
    assert jnp.allclose(wqz, ref_wqz, atol=5e-3, rtol=5e-3)
    # Exact reciprocal -> attention weights sum to 1 up to f32 rounding.
    assert jnp.allclose(jnp.sum(wqz, axis=1), 1.0, atol=1e-5)

    print("KERNEL_OK")
</pallas_src>

<mosaic_0001>
module attributes {stable_mosaic.version = 11 : i64} {
  func.func @_attention_kernel(%arg0: i32, %arg1: memref<16x32xf32, #tpu.memory_space<vmem>>, %arg2: memref<16x32xf32, #tpu.memory_space<vmem>>, %arg3: memref<32x16xf32, #tpu.memory_space<vmem>>, %arg4: memref<1x16xf32, #tpu.memory_space<vmem>>, %arg5: memref<16x32xf32, #tpu.memory_space<vmem>>, %arg6: memref<16x2xf32, #tpu.memory_space<vmem>>) attributes {dimension_semantics = [#tpu.dimension_semantics<parallel>], iteration_bounds = array<i64: 1>, scalar_prefetch = 0 : i64, scratch_operands = 0 : i64, tpu.core_type = #tpu.core_type<tc>, window_params = [{transform_indices = @transform_0, window_bounds = array<i64: 16, 32>}, {transform_indices = @transform_1, window_bounds = array<i64: 16, 32>}, {pipeline_mode = #tpu.pipeline_mode<synchronous>, transform_indices = @transform_2, window_bounds = array<i64: 32, 16>}, {pipeline_mode = #tpu.pipeline_mode<synchronous>, transform_indices = @transform_3, window_bounds = array<i64: 1, 16>}, {transform_indices = @transform_4, window_bounds = array<i64: 16, 32>}, {transform_indices = @transform_5, window_bounds = array<i64: 16, 2>}]} {
    %c0 = arith.constant 0 : index
    %c0_0 = arith.constant 0 : index
    %0 = vector.load %arg1[%c0, %c0_0] : memref<16x32xf32, #tpu.memory_space<vmem>>, vector<16x32xf32>
    %c0_1 = arith.constant 0 : index
    %c0_2 = arith.constant 0 : index
    %1 = vector.load %arg2[%c0_1, %c0_2] : memref<16x32xf32, #tpu.memory_space<vmem>>, vector<16x32xf32>
    %c0_3 = arith.constant 0 : index
    %c0_4 = arith.constant 0 : index
    %2 = vector.load %arg3[%c0_3, %c0_4] : memref<32x16xf32, #tpu.memory_space<vmem>>, vector<32x16xf32>
    %c0_5 = arith.constant 0 : index
    %c0_6 = arith.constant 0 : index
    %3 = vector.load %arg4[%c0_5, %c0_6] : memref<1x16xf32, #tpu.memory_space<vmem>>, vector<1x16xf32>
    %cst = arith.constant dense<0.000000e+00> : vector<16x16xf32>
    %4 = tpu.matmul %0, %2, %cst {dimension_numbers = #tpu.dot_dimension_numbers<[1], [0], [0], [1], [0, 0, 1, 1], [], []>} : vector<16x32xf32>, vector<32x16xf32>, vector<16x16xf32> -> vector<16x16xf32>
    %5 = math.tanh %4 : vector<16x16xf32>
    %cst_7 = arith.constant dense<0.000000e+00> : vector<16x16xf32>
    %6 = tpu.matmul %1, %2, %cst_7 {dimension_numbers = #tpu.dot_dimension_numbers<[1], [0], [0], [1], [0, 0, 1, 1], [], []>} : vector<16x32xf32>, vector<32x16xf32>, vector<16x16xf32> -> vector<16x16xf32>
    %7 = math.tanh %6 : vector<16x16xf32>
    %8 = vector.broadcast %3 : vector<1x16xf32> to vector<16x16xf32>
    %9 = arith.mulf %5, %8 : vector<16x16xf32>
    %cst_8 = arith.constant dense<0.000000e+00> : vector<16xf32>
    %10 = vector.multi_reduction <add>, %9, %cst_8 [1] : vector<16x16xf32> to vector<16xf32>
    %11 = vector.shape_cast %10 : vector<16xf32> to vector<16x1xf32>
    %cst_9 = arith.constant 9.99999997E-7 : f32
    %12 = vector.broadcast %cst_9 : f32 to vector<16x1xf32>
    %13 = arith.addf %11, %12 : vector<16x1xf32>
    %14 = vector.broadcast %3 : vector<1x16xf32> to vector<16x16xf32>
    %15 = arith.mulf %7, %14 : vector<16x16xf32>
    %cst_10 = arith.constant dense<0.000000e+00> : vector<16xf32>
    %16 = vector.multi_reduction <add>, %15, %cst_10 [1] : vector<16x16xf32> to vector<16xf32>
    %17 = vector.shape_cast %16 : vector<16xf32> to vector<16x1xf32>
    %cst_11 = arith.constant 9.99999997E-7 : f32
    %18 = vector.broadcast %cst_11 : f32 to vector<16x1xf32>
    %19 = arith.addf %17, %18 : vector<16x1xf32>
    %20 = arith.maximumf %13, %19 : vector<16x1xf32>
    %21 = arith.subf %13, %20 : vector<16x1xf32>
    %22 = math.exp %21 : vector<16x1xf32>
    %23 = arith.subf %19, %20 : vector<16x1xf32>
    %24 = math.exp %23 : vector<16x1xf32>
    %25 = arith.addf %22, %24 : vector<16x1xf32>
    %cst_12 = arith.constant 1.000000e+00 : f32
    %26 = vector.broadcast %cst_12 : f32 to vector<16x1xf32>
    %27 = arith.divf %26, %25 : vector<16x1xf32>
    %28 = arith.mulf %22, %27 : vector<16x1xf32>
    %29 = arith.mulf %24, %27 : vector<16x1xf32>
    %30 = vector.broadcast %28 : vector<16x1xf32> to vector<16x32xf32>
    %31 = arith.mulf %30, %0 : vector<16x32xf32>
    %32 = vector.broadcast %29 : vector<16x1xf32> to vector<16x32xf32>
    %33 = arith.mulf %32, %1 : vector<16x32xf32>
    %34 = arith.addf %31, %33 : vector<16x32xf32>
    %c0_13 = arith.constant 0 : index
    %c0_14 = arith.constant 0 : index
    %35 = vector.load %arg5[%c0_13, %c0_14] : memref<16x32xf32, #tpu.memory_space<vmem>>, vector<16x32xf32>
    tpu.vector_store %arg5[%c0_13, %c0_14], %34 {strides = array<i32>} : memref<16x32xf32, #tpu.memory_space<vmem>>, vector<16x32xf32>,
    %36 = tpu.concatenate %28, %29 in 1 : vector<16x1xf32>, vector<16x1xf32> -> vector<16x2xf32>
    %c0_15 = arith.constant 0 : index
    %c0_16 = arith.constant 0 : index
    %37 = vector.load %arg6[%c0_15, %c0_16] : memref<16x2xf32, #tpu.memory_space<vmem>>, vector<16x2xf32>
    tpu.vector_store %arg6[%c0_15, %c0_16], %36 {strides = array<i32>} : memref<16x2xf32, #tpu.memory_space<vmem>>, vector<16x2xf32>,
    return
  }
  func.func @transform_0(%arg0: i32) -> (i32, i32) {
    %c0_i32 = arith.constant 0 : i32
    %c0_i32_0 = arith.constant 0 : i32
    return %arg0, %c0_i32 : i32, i32
  }
  func.func @transform_1(%arg0: i32) -> (i32, i32) {
    %c0_i32 = arith.constant 0 : i32
    %c0_i32_0 = arith.constant 0 : i32
    return %arg0, %c0_i32 : i32, i32
  }
  func.func @transform_2(%arg0: i32) -> (i32, i32) {
    %c0_i32 = arith.constant 0 : i32
    %c0_i32_0 = arith.constant 0 : i32
    %c0_i32_1 = arith.constant 0 : i32
    return %c0_i32, %c0_i32_0 : i32, i32
  }
  func.func @transform_3(%arg0: i32) -> (i32, i32) {
    %c0_i32 = arith.constant 0 : i32
    %c0_i32_0 = arith.constant 0 : i32
    %c0_i32_1 = arith.constant 0 : i32
    return %c0_i32, %c0_i32_0 : i32, i32
  }
  func.func @transform_4(%arg0: i32) -> (i32, i32) {
    %c0_i32 = arith.constant 0 : i32
    %c0_i32_0 = arith.constant 0 : i32
    return %arg0, %c0_i32 : i32, i32
  }
  func.func @transform_5(%arg0: i32) -> (i32, i32) {
    %c0_i32 = arith.constant 0 : i32
    %c0_i32_0 = arith.constant 0 : i32
    return %arg0, %c0_i32 : i32, i32
  }
}

</mosaic_0001>

<bundles_post_ra>
// kernel: attention_layer.1
= control target key start
LH: loop header
LB: loop body
LE: loop exit
PB: predicated region body
PF: predicated region fallthrough
CT: control target
= control target key end

     0   :  { %vm29_vm0 = vcmask 261120   ;;  %s485_s0 = inlined_call_operand.vmem [shape: f32[16,32], index: 0, kind: input, shape index: {}]   ;;  %s486_s1 = inlined_call_operand.vmem [shape: f32[16,32], index: 1, kind: input, shape index: {}]   ;;  %s487_s2 = inlined_call_operand.vmem [shape: f32[32,16], index: 2, kind: input, shape index: {}]   ;;  %s488_s3 = inlined_call_operand.vmem [shape: f32[1,16], index: 3, kind: input, shape index: {}]   ;;  %s489_s4 = inlined_call_operand.hbm [shape: f32[16,32], index: 4, kind: output, shape index: {0}]   ;;  %s490_s5 = inlined_call_operand.vmem [shape: f32[16,2], index: 5, kind: output, shape index: {1}]  }
   0x1   :  { %v24_v0 = vld [vmem:[%s487_s2] sm:$0xff]  ;;  %v25_v1 = vld [vmem:[%s487_s2 + $0x8] sm:$0xff]  ;;  %v26_v2 = vld [vmem:[%s487_s2 + $0x10] sm:$0xff] }
   0x2   :  { %v320_v3 = vpack.c.bf16 %v25_v1, %v24_v0  ;;  %v27_v4 = vld [vmem:[%s487_s2 + $0x18] sm:$0xff]  ;;  %v431_v5 = vld [vmem:[%s485_s0] sm:$0xff] }
   0x3   :  { %v436_v6 = vld [vmem:[%s486_s1] sm:$0xff]  ;;  %v324_v7 = vpack.c.bf16 %v27_v4, %v26_v2  ;;  %306 = vmatprep.mubr.msk.f32.mxu0 %vm29_vm0, %v431_v5 }
   0x4   :  { %317 = vmatprep.mubr.msk.f32.mxu1 %vm29_vm0, %v436_v6 }
   0x5   :  { %11 = vsyncpa [#allocation3], 0  ;;  %321 = vmatprep.subr.bf16.mxu0 %v320_v3  ;;  %329 = vmatprep.subr.bf16.mxu1 %v320_v3  ;;  %v445_v8 = vld [vmem:[%s485_s0 + $0x8] sm:$0xff]  ;;  %v285_v15 = vld [vmem:[%s488_s3] ss:$0 sm:$0xff]  ;;  %vm204_vm1 = vcmask 130048  }
   0x6   :  { %323 = vmatpush3.bf16.msra.mxu0 %v320_v3  ;;  %331 = vmatpush3.bf16.msra.mxu1 %v320_v3  ;;  %v450_v9 = vld [vmem:[%s486_s1 + $0x8] sm:$0xff]  ;;  %vm255_vm2 = vcmask 7168   ;;  %vm258_vm3 = vcmask 15360   ;;  %s383_s9 = smov [#allocation2]  }
   0x7   :  { %325 = vmatprep.subr.bf16.mxu0 %v324_v7  ;;  %333 = vmatprep.subr.bf16.mxu1 %v324_v7  ;;  %s266_s10 = sshll.u32 %s383_s9, 4  ;;  %s267_s10 = int_to_ptr.vmem [resolvable:$true] %s266_s10 }
   0x8   :  { %s359_s13 = scalar_lea.vmem %s267_s10, 256  ;;  %p364_p1 = scmp.lt.s32.totalorder %s267_s10, %s267_s10 }
   0x9   :  { %p360_p0 = scmp.ne.s32.totalorder %s267_s10, %s359_s13  ;;  %p365_p2 = scmp.lt.s32.totalorder %s359_s13, %s359_s13 }
   0xa   :  { %327 = vmatpush3.bf16.msra.mxu0 %v324_v7  ;;  %335 = vmatpush3.bf16.msra.mxu1 %v324_v7 }
   0xb   :  { %p366_p3 = por %p365_p2, %p364_p1 }
   0xd   :  { %307 = vmatmul.mubr.msk.f32.vlgmr.msra.gmra.mrb[0].mxu0 %vm29_vm0, %v445_v8  ;;  %318 = vmatmul.mubr.msk.f32.vlgmr.msra.gmra.mrb[0].mxu1 %vm29_vm0, %v450_v9  ;;  %p367_p4 = pnand %p366_p3, %p360_p0 }
  0xe0   :  { %v308_v10 = vpop.f32.mrb[0].mxu0  ;;  %v319_v11 = vpop.f32.mrb[0].mxu1 }
  0xe1   :  { %339 = vtanh.f32 %v308_v10  ;;  %v102_v12 = vpop.f32.mrb[1].mxu0  ;;  %v185_v13 = vpop.f32.mrb[1].mxu1 }
  0xe2   :  { %341 = vtanh.f32 %v319_v11 }
  0xe3   :  { %343 = vtanh.f32 %v102_v12 }
  0xe4   :  { %345 = vtanh.f32 %v185_v13 }
  0xeb   :  { %v340_v14 = vpop.eup %339 }
  0xec   :  { %v342_v16 = vpop.eup %341  ;;  %v203_v22 = vmul.f32 %v340_v14, %v285_v15 }
  0xed   :  { %v344_v17 = vpop.eup %343  ;;  %v214_v24 = vmul.f32 %v342_v16, %v285_v15 }
  0xee   :  { %v346_v18 = vpop.eup %345  ;;  %v202_v19 = vmul.f32 %v344_v17, %v285_v15  ;;  %v208_v25 = vsel %vm204_vm1, %v203_v22, 0.0 }
  0xef   :  { %v213_v20 = vmul.f32 %v346_v18, %v285_v15  ;;  %v218_v26 = vsel %vm204_vm1, %v214_v24, 0.0 }
  0xf0   :  { %v205_v21 = vsel %vm204_vm1, %v202_v19, 0.0 }
  0xf1   :  { %v215_v23 = vsel %vm204_vm1, %v213_v20, 0.0  ;;  %206 = vadd.xlane.f32.xlu0 %v205_v21 }
  0xf2   :  { %216 = vadd.xlane.f32.xlu1 %v215_v23 }
  0xf5   :  { %209 = vadd.xlane.f32.xlu0 %v208_v25 }
  0xf6   :  { %219 = vadd.xlane.f32.xlu1 %v218_v26 }
 0x17e   :  { %v207_v27 = vpop.xlane.xlu0 %206 }
 0x17f   :  { %v217_v28 = vpop.xlane.xlu1 %216  ;;  %v211_v29 = vadd.f32 1e-06, %v207_v27 }
 0x180   :  { %v221_v30 = vadd.f32 1e-06, %v217_v28 }
 0x182   :  { %v223_v31 = vmax.f32 %v211_v29, %v221_v30  ;;  %v210_v32 = vpop.xlane.xlu0 %209 }
 0x183   :  { %v220_v33 = vpop.xlane.xlu1 %219  ;;  %v212_v34 = vadd.f32 1e-06, %v210_v32 }
 0x184   :  { %v225_v35 = vsub.f32 %v211_v29, %v223_v31  ;;  %v231_v36 = vsub.f32 %v221_v30, %v223_v31  ;;  %v222_v37 = vadd.f32 1e-06, %v220_v33 }
 0x186   :  { %v227_v38 = vmul.f32 1.442695, %v225_v35  ;;  %v233_v39 = vmul.f32 1.442695, %v231_v36  ;;  %v224_v40 = vmax.f32 %v212_v34, %v222_v37 }
 0x188   :  { %347 = vpow2.f32 %v227_v38  ;;  %v226_v41 = vsub.f32 %v212_v34, %v224_v40  ;;  %v232_v42 = vsub.f32 %v222_v37, %v224_v40 }
 0x189   :  { %349 = vpow2.f32 %v233_v39 }
 0x18a   :  { %v229_v43 = vmul.f32 1.442695, %v226_v41  ;;  %v235_v44 = vmul.f32 1.442695, %v232_v42 }
 0x18c   :  { %351 = vpow2.f32 %v229_v43 }
 0x18d   :  { %353 = vpow2.f32 %v235_v44 }
 0x192   :  { %v348_v45 = vpop.eup %347 }
 0x193   :  { %v350_v46 = vpop.eup %349 }
 0x194   :  { %v237_v47 = vadd.f32 %v350_v46, %v348_v45 }
 0x196   :  { %v352_v48 = vpop.eup %351  ;;  %355 = vrcp.f32 %v237_v47 }
 0x197   :  { %v354_v49 = vpop.eup %353 }
 0x198   :  { %v238_v50 = vadd.f32 %v354_v49, %v352_v48 }
 0x19a   :  { %357 = vrcp.f32 %v238_v50 }
 0x1a0   :  { %v356_v51 = vpop.eup %355 }
 0x1a1   :  { %v243_v52 = vmul.f32 %v356_v51, %v348_v45  ;;  %v245_v53 = vmul.f32 %v356_v51, %v350_v46 }
 0x1a3   :  { %v247_v54 = vmul.f32 %v243_v52, %v431_v5  ;;  %v249_v55 = vmul.f32 %v245_v53, %v436_v6  ;;  %v256_v56 = vsel %vm255_vm2, %v243_v52, %v245_v53 }
 0x1a4   :  { %v358_v57 = vpop.eup %357  ;;  %259 = vst.msk [vmem:[%s490_s5] sm:$0xff] %vm258_vm3, %v256_v56 }
 0x1a5   :  { %v244_v58 = vmul.f32 %v358_v57, %v352_v48  ;;  %v246_v59 = vmul.f32 %v358_v57, %v354_v49  ;;  %v251_v60 = vadd.f32 %v249_v55, %v247_v54 }
 0x1a7   :  { %v248_v61 = vmul.f32 %v244_v58, %v445_v8  ;;  %v250_v62 = vmul.f32 %v246_v59, %v450_v9  ;;  %253 = vst.msk [vmem:[#allocation2] sm:$0xff] %vm29_vm0, %v251_v60  ;;  %v257_v63 = vsel %vm255_vm2, %v244_v58, %v246_v59 }
 0x1a8   :  { %260 = vst.msk [vmem:[%s490_s5 + $0x8] sm:$0xff] %vm258_vm3, %v257_v63 }
 0x1a9   :  { %v252_v0 = vadd.f32 %v250_v62, %v248_v61 }
 0x1ab   :  { %254 = vst.msk [vmem:[#allocation2 + $0x8] sm:$0xff] %vm29_vm0, %v252_v0 }
 0x1ac   :  { %370 = shalt.err (!%p367_p4)
}
 0x1ad   :  { %s371_s16 = scalar_lea.hbm %s489_s4, 256 }
 0x1ae   :  { %p372_p5 = scmp.ne.s32.totalorder %s489_s4, %s371_s16  ;;  %p375_p6 = scmp.lt.u32.totalorder %s371_s16, %s489_s4 }
 0x1b0   :  { %p377_p7 = pnand %p375_p6, %p372_p5 }
 0x1b2   :  { %380 = shalt.err (!%p377_p7)
}
 0x1b3   :  { %s384_s20 = smov 128   ;;  %s385_s21 = smov 8  }
 0x1b4   :  { %272 = dma.vmem_to_hbm [thread:$0]  %s267_s10, 256, %s489_s4, [#allocation3], %s384_s20, %s384_s20, %s385_s21  }
 0x1b5   :  { %381 = dma.done.wait [#allocation3], 256  }
 0x1b6   :  { %382 = vsyncadd [#allocation3], 4294967040 }
 0x1b7   :  { %280 = vsyncpa [#allocation3], 1 }

</bundles_post_ra>
